<compile_context>
chip_gen: v7x
topology: tpu7x:2x2x1
jax: 0.10.0
libtpu: 0.0.40
codegen_flags: <defaults>
</compile_context>

<pallas_src>
import functools

import jax
import jax.numpy as jnp
from jax.experimental import pallas as pl
from jax.experimental.pallas import tpu as pltpu

_LANE = 512  # lane-dense slab width used when the trailing dim is not 128-aligned


def _truncated_gaussian_kernel(bw_ref, d_ref, o_ref, *, truncation):
    """Elementwise truncated-Gaussian on one (TM, W) tile. bw_ref is an SMEM scalar."""
    # Scalar reciprocal on the scalar unit, then a single vmul per vreg
    # (compute stays f32: v5e has no bf16 VPU/EUP path).
    inv_bw = 1.0 / bw_ref[0]
    d = d_ref[...].astype(jnp.float32)
    kern = jnp.exp(-(d * inv_bw))
    if truncation is not None:
        # _direct_truncate forward: distance/bw > truncation/bw.detach() -> +inf -> exp -> 0.
        # For bandwidth > 0 this equals comparing the raw distance against the
        # compile-time constant `truncation`.
        kern = jnp.where(d > jnp.float32(truncation), jnp.float32(0.0), kern)
    o_ref[...] = kern.astype(o_ref.dtype)


def _lane_dense_2d(distance):
    """Return (2D lane-dense view, n_valid). Free reshape if last dim % 128 == 0."""
    n = distance.size
    if distance.ndim >= 2 and distance.shape[-1] % 128 == 0 and distance.shape[-1] >= 128:
        v = distance.shape[-1]
        return distance.reshape(n // v, v), n
    # Elementwise op: flatten, pad the tail up to a multiple of _LANE, reshape.
    flat = distance.reshape(-1)
    n_pad = ((n + _LANE - 1) // _LANE) * _LANE
    if n_pad != n:
        flat = jnp.pad(flat, (0, n_pad - n))
    return flat.reshape(n_pad // _LANE, _LANE), n


def _choose_row_tile(rows, lane, in_bytes, out_bytes):
    """Row-tile sized by a ~4 MiB/buffer budget; >=2 grid steps when possible (v7x)."""
    target_tile_bytes = 4 * 1024 * 1024
    per_row_bytes = lane * max(in_bytes, out_bytes)
    tm = max(8, (target_tile_bytes // per_row_bytes) // 8 * 8)
    if rows <= 8:
        return rows  # single full-extent block (can't split further)
    # Ensure at least 2 grid steps so both v7x TensorCores get work.
    tm = min(tm, max(8, ((rows - 1) // 8) * 8))
    return tm


def truncated_gaussian_pallas(distance, bandwidth, truncation=None):
    """distance: (..., V) float tensor; bandwidth: (1,) float32 parameter."""
    orig_shape = distance.shape
    out_dtype = distance.dtype

    d2, n_valid = _lane_dense_2d(distance)
    rows, lane = d2.shape

    in_bytes = d2.dtype.itemsize
    out_bytes = jnp.dtype(out_dtype).itemsize
    tm = _choose_row_tile(rows, lane, in_bytes, out_bytes)
    grid = (pl.cdiv(rows, tm),)

    tile_in = tm * lane * in_bytes
    tile_out = tm * lane * out_bytes
    vmem_limit = min(48 * 1024 * 1024,
                     max(16 * 1024 * 1024, 2 * (tile_in + tile_out) + 8 * 1024 * 1024))

    n_elems = rows * lane
    kern_fn = functools.partial(_truncated_gaussian_kernel, truncation=truncation)
    out2 = pl.pallas_call(
        kern_fn,
        out_shape=jax.ShapeDtypeStruct((rows, lane), out_dtype),
        grid=grid,
        in_specs=[
            pl.BlockSpec(memory_space=pltpu.MemorySpace.SMEM),   # bandwidth scalar
            pl.BlockSpec((tm, lane), lambda i: (i, 0)),          # distance tile
        ],
        out_specs=pl.BlockSpec((tm, lane), lambda i: (i, 0)),
        compiler_params=pltpu.CompilerParams(
            dimension_semantics=("parallel",),
            vmem_limit_bytes=vmem_limit,
        ),
        cost_estimate=pl.CostEstimate(
            flops=2 * n_elems,
            transcendentals=n_elems,
            bytes_accessed=n_elems * (in_bytes + out_bytes),
        ),
    )(bandwidth, d2)

    if out2.size != n_valid:
        out2 = out2.reshape(-1)[:n_valid]
    return out2.reshape(orig_shape)


class KernelPallas:
    """JAX/Pallas port of `Kernel` with default-flag forward semantics."""

    def __init__(self, truncation=None, initial_bandwidth=1.0):
        self.truncation = truncation
        # deterministic parameter init (matches nn.Parameter(torch.tensor(1.0)))
        self.bandwidth = jnp.full((1,), float(initial_bandwidth), dtype=jnp.float32)

    def truncated_gaussian(self, distance):
        return truncated_gaussian_pallas(distance, self.bandwidth, self.truncation)

    def sample_kernel(self, kernel):
        # stochastic_kernel=False (default) -> identity
        return kernel

    def __call__(self, distance):
        return self.sample_kernel(self.truncated_gaussian(distance))


def _reference(distance, bandwidth, truncation):
    scaled = distance / bandwidth[0]
    if truncation is None:
        return jnp.exp(-scaled)
    trunc = jnp.where(scaled > truncation / bandwidth[0], jnp.inf, scaled)
    return jnp.exp(-trunc)


if __name__ == "__main__":
    key = jax.random.PRNGKey(0)
    k1, k2 = jax.random.split(key)
    B, F, V = 2, 8, 128  # batch, num_functions, num_variables
    # distances are non-negative (as produced by any distance metric subclass)
    distance = jax.random.uniform(k1, (B, F, V), dtype=jnp.float32, minval=0.0, maxval=4.0)

    # no-truncation path (f32, lane-aligned V)
    mod_plain = KernelPallas(truncation=None, initial_bandwidth=1.0)
    out_plain = jax.block_until_ready(mod_plain(distance))
    ref_plain = _reference(distance, mod_plain.bandwidth, None)

    # direct-truncation path (f32, lane-aligned V)
    mod_trunc = KernelPallas(truncation=2.0, initial_bandwidth=1.5)
    out_trunc = jax.block_until_ready(mod_trunc(distance))
    ref_trunc = _reference(distance, mod_trunc.bandwidth, 2.0)

    # bf16 input + non-128-aligned trailing dim -> lane-dense padded slab path
    V2 = 100
    d_bf16 = jax.random.uniform(k2, (B, F, V2), dtype=jnp.float32,
                                minval=0.0, maxval=4.0).astype(jnp.bfloat16)
    out_bf16 = jax.block_until_ready(mod_trunc(d_bf16))
    ref_bf16 = _reference(d_bf16.astype(jnp.float32), mod_trunc.bandwidth, 2.0)

    assert out_plain.shape == (B, F, V) and out_plain.dtype == jnp.float32
    assert out_trunc.shape == (B, F, V) and out_trunc.dtype == jnp.float32
    assert out_bf16.shape == (B, F, V2) and out_bf16.dtype == jnp.bfloat16
    assert jnp.allclose(out_plain, ref_plain, atol=1e-6, rtol=1e-5)
    assert jnp.allclose(out_trunc, ref_trunc, atol=1e-6, rtol=1e-5)
    assert jnp.allclose(out_bf16.astype(jnp.float32), ref_bf16, atol=2e-2, rtol=2e-2)

    print("KERNEL_OK")
</pallas_src>

<mosaic_0001>
module attributes {stable_mosaic.version = 11 : i64} {
  func.func @_truncated_gaussian_kernel(%arg0: i32, %arg1: memref<1xf32, #tpu.memory_space<smem>>, %arg2: memref<8x128xf32, #tpu.memory_space<vmem>>, %arg3: memref<8x128xf32, #tpu.memory_space<vmem>>) attributes {dimension_semantics = [#tpu.dimension_semantics<parallel>], iteration_bounds = array<i64: 2>, scalar_prefetch = 0 : i64, scratch_operands = 0 : i64, tpu.core_type = #tpu.core_type<tc>, window_params = [{transform_indices = @transform_0, window_bounds = array<i64: 1>}, {transform_indices = @transform_1, window_bounds = array<i64: 8, 128>}, {transform_indices = @transform_2, window_bounds = array<i64: 8, 128>}]} {
    %c0 = arith.constant 0 : index
    %0 = memref.load %arg1[%c0] : memref<1xf32, #tpu.memory_space<smem>>
    %cst = arith.constant 1.000000e+00 : f32
    %1 = arith.divf %cst, %0 : f32
    %c0_0 = arith.constant 0 : index
    %c0_1 = arith.constant 0 : index
    %2 = vector.load %arg2[%c0_0, %c0_1] : memref<8x128xf32, #tpu.memory_space<vmem>>, vector<8x128xf32>
    %3 = vector.broadcast %1 : f32 to vector<8x128xf32>
    %4 = arith.mulf %2, %3 : vector<8x128xf32>
    %cst_2 = arith.constant 0.000000e+00 : f32
    %5 = vector.broadcast %cst_2 : f32 to vector<8x128xf32>
    %6 = arith.subf %5, %4 : vector<8x128xf32>
    %7 = math.exp %6 : vector<8x128xf32>
    %c0_3 = arith.constant 0 : index
    %c0_4 = arith.constant 0 : index
    %8 = vector.load %arg3[%c0_3, %c0_4] : memref<8x128xf32, #tpu.memory_space<vmem>>, vector<8x128xf32>
    tpu.vector_store %arg3[%c0_3, %c0_4], %7 {strides = array<i32>} : memref<8x128xf32, #tpu.memory_space<vmem>>, vector<8x128xf32>,
    return
  }
  func.func @transform_0(%arg0: i32) -> i32 {
    %c0_i32 = arith.constant 0 : i32
    %c0_i32_0 = arith.constant 0 : i32
    return %c0_i32 : i32
  }
  func.func @transform_1(%arg0: i32) -> (i32, i32) {
    %c0_i32 = arith.constant 0 : i32
    %c0_i32_0 = arith.constant 0 : i32
    return %arg0, %c0_i32 : i32, i32
  }
  func.func @transform_2(%arg0: i32) -> (i32, i32) {
    %c0_i32 = arith.constant 0 : i32
    %c0_i32_0 = arith.constant 0 : i32
    return %arg0, %c0_i32 : i32, i32
  }
}

</mosaic_0001>

<bundles_post_ra>
// kernel: tpu_custom_call.1
= control target key start
LH: loop header
LB: loop body
LE: loop exit
PB: predicated region body
PF: predicated region fallthrough
CT: control target
= control target key end

     0   :  { %s598_s0 = inlined_call_operand.<no memory space> [shape: f32[1], index: 0, kind: input, shape index: {}]   ;;  %s599_s1 = inlined_call_operand.hbm [shape: f32[16,128], index: 1, kind: input, shape index: {}]   ;;  %s600_s2 = inlined_call_operand.hbm [shape: f32[16,128], index: 2, kind: output, shape index: {}]  }
   0x1   :  { %7 = sst [smem:[#allocation2]] %s598_s0 }
   0x2   :  { %8 = vsyncpa [#allocation4], 0 }
   0x3   :  { %10 = vsyncpa [#allocation4 + $0x1], 0 }
   0x4   :  { %11 = vsyncpa [#allocation5], 0 }
   0x5   :  { %13 = vsyncpa [#allocation5 + $0x1], 0  ;;  %s437_s11 = smov 0   ;;  %s439_s12 = smov 0  }
   0x6   :  { %s441_s13 = smov 0   ;;  %s443_s14 = smov 0  }
   0x7 LB: > { %s458_s0 = sadd.s32 4294967295, %s415_s14   ;;  %s255_s15 = sadd.s32 4294967294, %s415_s14   ;;  %s415_s14 = sphi %s443_s14, %s615_s14   ;;  %s411_s13 = sphi %s441_s13, %s614_s13   ;;  %s407_s12 = sphi %s439_s12, %s613_s12   ;;  %s403_s11 = sphi %s437_s11, %s612_s11  }
   0x8   : > { %s462_s16 = sadd.s32 1, %s415_s14   ;;  %s47_s17 = sadd.s32 1, %s411_s13 }
   0x9   : > { %s44_s18 = ssub.s32 %s415_s14, %s462_s16  ;;  %p54_p0 = scmp.ne.s32.totalorder %s411_s13, %s407_s12 }
   0xa   : > { %p45_p1 = scmp.eq.s32.totalorder %s44_s18, 0  ;;  %p55_p2 = scmp.eq.s32.totalorder %s415_s14, 0 }
   0xb   : > { %p60_p3 = scmp.ne.s32.totalorder %s407_s12, %s403_s11  ;;  %p61_p4 = scmp.eq.s32.totalorder %s458_s0, 0 }
   0xc   : > { %s474_s19 = scalar_select %p45_p1, %s411_s13, %s47_s17  }
   0xd   : > { %p476_p5 = por %p55_p2, %p54_p0  ;;  %p480_p6 = por %p61_p4, %p60_p3 }
   0xe   : > { %p84_p7 = scmp.eq.s32.totalorder %s458_s0, 1  ;;  %p90_p8 = scmp.eq.s32.totalorder %s255_s15, 1 }
   0xf   : > { %p281_p10 = scmp.lt.s32.totalorder %s415_s14, 2  ;;  %s113_s24 = sand.u32 1, %s411_s13  }
  0x10   : > { %p487_p11 = por %p84_p7, %p54_p0  ;;  %p491_p12 = por %p90_p8, %p60_p3 }
  0x11   : > { %s259_s25 = sshll.u32 %s415_s14, 7  ;;  %s258_s26 = sshll.u32 %s113_s24, 3 }
  0x12   : > { %s604_s22 = scalar_select %p487_p11, 1, 0 }
  0x13   : > { %s605_s23 = scalar_select %p491_p12, 1, 0 }
  0x14   : > { %s500_s29 = scalar_lea.hbm %s599_s1, %s259_s25  ;;  %s117_s30 = scalar_lea.vmem [#allocation3], %s258_s26 }
  0x15   : > { %s124_s3 = sshll.u32 %s117_s30, 4  ;;  %p504_p13 = pnand %p281_p10, %p476_p5  ;;  %s508_s3 = int_to_ptr.vmem [resolvable:$true] %s124_s3 }
  0x16   : > { %s114_s5 = scalar_lea.sflag [#allocation4], %s113_s24  ;;  %s319_s6 = scalar_lea.hbm %s500_s29, 128 }
  0x17   : > { %p320_p2 = scmp.ne.s32.totalorder %s500_s29, %s319_s6  ;;  %p321_p3 = pneg %p504_p13 }
  0x18   : > { %s324_s9 = scalar_lea.hbm %s599_s1, 256  ;;  %p325_p5 = scmp.lt.u32.totalorder %s500_s29, %s599_s1 }
  0x19   : > { %p322_p4 = pnand %p321_p3, %p320_p2  ;;  %p326_p8 = scmp.lt.u32.totalorder %s324_s9, %s319_s6 }
  0x1a   : > { %p328_p9 = scmp.lt.u32.totalorder %s319_s6, %s500_s29 }
  0x1b   : > { %p323_p7 = pneg %p322_p4  ;;  %p327_p10 = por %p326_p8, %p325_p5 }
  0x1d   : > { %p329_p0 = por %p328_p9, %p327_p10 }
  0x1f   : > { %p330_p1 = pnand %p329_p0, %p323_p7 }
  0x21   : > { %333 = shalt.err (!%p330_p1)
}
  0x22   : > { %s334_s17 = scalar_lea.vmem %s508_s3, 128  ;;  %s417_s18 = smov [#allocation3]  }
  0x23   : > { %p335_p2 = scmp.ne.s32.totalorder %s508_s3, %s334_s17  ;;  %s339_s20 = sshll.u32 %s417_s18, 4  ;;  %s340_s20 = int_to_ptr.vmem [resolvable:$false] %s339_s20 }
  0x24   : > { %s341_s24 = scalar_lea.vmem %s340_s20, 256  ;;  %p342_p11 = scmp.lt.s32.totalorder %s508_s3, %s340_s20 }
  0x25   : > { %p337_p4 = pnand %p335_p2, %p321_p3  ;;  %p343_p5 = scmp.lt.s32.totalorder %s341_s24, %s334_s17 }
  0x27   : > { %p338_p12 = pneg %p337_p4  ;;  %p344_p8 = por %p343_p5, %p342_p11 }
  0x29   : > { %p345_p9 = pnand %p344_p8, %p338_p12 }
  0x2b   : > { %348 = shalt.err (!%p345_p9)
}
  0x2c   : > { %276 = dma.hbm_to_vmem [thread:$0]  (!%p504_p13), %s500_s29, 128, %s508_s3, %s114_s5  }
  0x2d   : > { %p607_p0 = scmp.lt.s32.totalorder %s415_s14, 3  ;;  %p608_p1 = scmp.ge.s32.totalorder %s415_s14, 1 }
  0x2f   : > { %p130_p3 = pnand %p608_p1, %p607_p0 }
  0x30   : > { %s542_s25 = sand.u32 (!%p130_p3), 1, %s407_s12  }
  0x31   : > { %133 = sbr.rel (%p130_p3) target bundleno = 157 (0x9d), region = 28  ;;  %s261_s26 = sshll.u32 (!%p130_p3), %s542_s25, 3 }
  0x32   : > { %s136_s27 = scalar_lea.sflag (!%p130_p3), [#allocation4], %s542_s25  ;;  %s139_s28 = scalar_lea.vmem (!%p130_p3), [#allocation3], %s261_s26 }
  0x38   : > { %394 = dma.done.wait (%p480_p6), %s136_s27, 128  }
  0x39   : > { %396 = vsyncadd (%p480_p6), %s136_s27, 4294967168  ;;  %s160_s29 = sld [smem:[#allocation2]]  ;;  %v164_v2 = vld [vmem:[%s139_s28] sm:$0xff]  ;;  %s264_s3 = sshll.u32 %s458_s0, 7 }
  0x3a   : > { %s159_s4 = scalar_lea.vmem [#allocation6], %s261_s26  ;;  %s554_s7 = scalar_lea.hbm %s600_s2, %s264_s3 }
  0x3b   : > { %s185_s5 = sshll.u32 %s159_s4, 4  ;;  %s172_s8 = scalar_lea.sflag [#allocation5], %s542_s25  ;;  %s556_s5 = int_to_ptr.vmem [resolvable:$true] %s185_s5 }
  0x3c   : > { %s349_s9 = scalar_lea.vmem %s556_s5, 128  ;;  %p609_p11 = scmp.ne.s32.totalorder %s604_s22, 0 }
  0x3d   : > { %p350_p6 = scmp.ne.s32.totalorder %s556_s5, %s349_s9  ;;  %s418_s0 = smov [#allocation6]  }
  0x3e   : > { %s353_s10 = sshll.u32 %s418_s0, 4  ;;  %s354_s10 = int_to_ptr.vmem [resolvable:$false] %s353_s10 }
  0x3f   : > { %v161_v0 = vstv %s160_s29  ;;  %p351_p12 = pnand %p350_p6, %p609_p11  ;;  %s355_s15 = scalar_lea.vmem %s354_s10, 256 }
  0x40   : > { %315 = vrcp.f32 %v161_v0  ;;  %p356_p7 = scmp.lt.s32.totalorder %s556_s5, %s354_s10  ;;  %p357_p10 = scmp.lt.s32.totalorder %s355_s15, %s349_s9 }
  0x41   : > { %p352_p13 = pneg %p351_p12 }
  0x42   : > { %p358_p2 = por %p357_p10, %p356_p7 }
  0x44   : > { %p359_p4 = pnand %p358_p2, %p352_p13 }
  0x4a   : > { %v316_v1 = vpop.eup %315 }
  0x4b   : > { %267 = vpush %v316_v1 }
  0x7c   : > { %s268_s30 = spop %267 }
  0x7d   : > { %v165_v3 = vstv %s268_s30 }
  0x7e   : > { %v166_v4 = vmul.f32 %v165_v3, %v164_v2 }
  0x80   : > { %v167_v5 = vsub.f32 0.0, %v166_v4 }
  0x82   : > { %v168_v6 = vmul.f32 1.442695, %v167_v5 }
  0x84   : > { %317 = vpow2.f32 %v168_v6 }
  0x8e   : > { %v318_v7 = vpop.eup %317 }
  0x8f   : > { %170 = vst [vmem:[%s159_s4] sm:$0xff] %v318_v7 }
  0x90   : > { %362 = shalt.err (!%p359_p4)
}
  0x91   : > { %s363_s17 = scalar_lea.hbm %s554_s7, 128  ;;  %s367_s24 = scalar_lea.hbm %s600_s2, 256 }
  0x92   : > { %p364_p5 = scmp.ne.s32.totalorder %s554_s7, %s363_s17  ;;  %p368_p0 = scmp.lt.u32.totalorder %s554_s7, %s600_s2 }
  0x93   : > { %p369_p1 = scmp.lt.u32.totalorder %s367_s24, %s363_s17  ;;  %p371_p6 = scmp.lt.u32.totalorder %s363_s17, %s554_s7 }
  0x94   : > { %p365_p8 = pnand %p364_p5, %p609_p11 }
  0x95   : > { %p370_p3 = por %p369_p1, %p368_p0 }
  0x96   : > { %p366_p9 = pneg %p365_p8 }
  0x97   : > { %p372_p12 = por %p371_p6, %p370_p3 }
  0x99   : > { %p373_p13 = pnand %p372_p12, %p366_p9 }
  0x9b   : > { %376 = shalt.err (!%p373_p13)
}
  0x9c   : > { %271 = dma.vmem_to_hbm [thread:$0]  (%p609_p11), %s556_s5, 128, %s554_s7, %s172_s8  }
  0x9d PF: > { %s197_s27 = sand.u32 1, %s403_s11   ;;  %p610_p7 = scmp.ne.s32.totalorder %s605_s23, 0 }
  0x9e   : > { %p611_p10 = scmp.ge.s32.totalorder %s415_s14, 2  ;;  %s198_s28 = scalar_lea.sflag [#allocation5], %s197_s27 }
  0xa0   : > { %p278_p2 = pnand %p611_p10, %p610_p7 }
  0xa2   : > { %398 = dma.done.wait (!%p278_p2), %s198_s28, 128  }
  0xa3   : > { %400 = vsyncadd (!%p278_p2), %s198_s28, 4294967168  ;;  %p16_p4 = scmp.ge.s32.totalorder %s462_s16, 4   ;;  %s612_s11 = smov %s407_s12 }
  0xa4   : > { %s613_s12 = smov %s411_s13  ;;  %s614_s13 = smov %s474_s19 }
  0xa5   : > { %s615_s14 = smov %s462_s16  ;;  %18 = sbr.rel (!%p16_p4) target bundleno = 7 (0x7), region = 73 }
  0xac   :  { %203 = vsyncpa [#allocation4], 1 }
  0xad   :  { %205 = vsyncpa [#allocation4 + $0x1], 1 }
  0xae   :  { %206 = vsyncpa [#allocation5], 1 }
  0xaf   :  { %208 = vsyncpa [#allocation5 + $0x1], 1 }

</bundles_post_ra>
